<compile_context>
chip_gen: v7x
topology: tpu7x:2x2x1
jax: 0.10.0
libtpu: 0.0.40
codegen_flags: <defaults>
</compile_context>

<pallas_src>
import functools
import math

import jax
import jax.numpy as jnp
from jax.experimental import pallas as pl
from jax.experimental.pallas import tpu as pltpu

_MiB = 1024 * 1024


def rmsnorm_kernel(x_ref, w_ref, o_ref, *, eps):
    # x_ref: (tn, D) input dtype; w_ref: (1, D) f32; o_ref: (tn, D) input dtype.
    xf = x_ref[...].astype(jnp.float32)
    ms = jnp.mean(xf * xf, axis=-1, keepdims=True)   # (tn, 1) lane reduce (XLU)
    inv = jax.lax.rsqrt(ms + eps)                     # EUP (free slot)
    o_ref[...] = (xf * inv * w_ref[...]).astype(o_ref.dtype)


def _vmem_capacity_bytes():
    try:
        return int(pltpu.get_tpu_info().vmem_capacity_bytes)
    except Exception:
        return 128 * _MiB  # v5e/v6e-class fallback


def _choose_row_tile(N, D, itemsize, vmem_cap):
    # Packed-sublane multiple so bf16/int8 tiles never fall below the minimum packed tile.
    row_mult = {1: 32, 2: 16}.get(itemsize, 8)

    # Byte budget per x block: multi-MiB for HBM-roofline streaming, halved on
    # 64-MiB-VMEM chips (v7x) so 2x double-buffered (in+out) blocks + f32 temps fit.
    target_block = 4 * _MiB if vmem_cap <= 64 * _MiB else 8 * _MiB
    tn = max(row_mult, (target_block // max(D * itemsize, 1)) // row_mult * row_mult)

    # Never larger than the (rounded-up) problem.
    tn = min(tn, pl.cdiv(N, row_mult) * row_mult)

    # Megacore (v7x): guarantee >= 2 grid steps so both TensorCores get work.
    if N >= 2 * row_mult:
        tn = min(tn, max(row_mult, (pl.cdiv(N, 2) // row_mult) * row_mult))

    # Prefer >= 8 steps when blocks stay comfortably large (>= 2 MiB).
    tn8 = (pl.cdiv(N, 8) // row_mult) * row_mult
    if tn8 >= row_mult and tn8 * D * itemsize >= 2 * _MiB:
        tn = min(tn, tn8)

    return tn


def rmsnorm_forward(x, weight, *, eps=1e-6):
    """x: (..., D) float dtype; weight: (D,). Returns same shape/dtype as x."""
    orig_shape = x.shape
    D = orig_shape[-1]
    N = math.prod(orig_shape[:-1]) if len(orig_shape) > 1 else 1

    x2 = x.reshape(N, D)
    w2 = weight.astype(jnp.float32).reshape(1, D)
    itemsize = jnp.dtype(x.dtype).itemsize

    vmem_cap = _vmem_capacity_bytes()
    tn = _choose_row_tile(N, D, itemsize, vmem_cap)
    num_steps = pl.cdiv(N, tn)          # ragged tail handled by Pallas edge-block masking
    block_bytes = tn * D * itemsize

    # Triple-buffer x only when per-step blocks are small and the pipeline is long
    # enough for the extra buffer to hide DMA-issue latency (minor, VMEM-cheap here).
    x_spec_kwargs = {}
    if block_bytes < 1 * _MiB and num_steps >= 4:
        x_spec_kwargs["pipeline_mode"] = pl.Buffered(3)

    cost = pl.CostEstimate(
        flops=4 * N * D,                 # square + reduce-add + inv-mul + weight-mul
        transcendentals=N,               # one rsqrt per row
        bytes_accessed=2 * N * D * itemsize + D * 4,
    )

    # Raise scoped VMEM so big tiles compile on v5e/v6e; stay well under v7x's 64 MiB.
    vmem_limit = int(min(vmem_cap * 3 // 4, 100 * _MiB))

    out = pl.pallas_call(
        functools.partial(rmsnorm_kernel, eps=eps),
        out_shape=jax.ShapeDtypeStruct((N, D), x.dtype),
        grid=(num_steps,),
        in_specs=[
            pl.BlockSpec((tn, D), lambda i: (i, 0), **x_spec_kwargs),  # lane-dense x tile
            pl.BlockSpec((1, D), lambda i: (0, 0)),                    # resident weight
        ],
        out_specs=pl.BlockSpec((tn, D), lambda i: (i, 0)),
        compiler_params=pltpu.CompilerParams(
            dimension_semantics=("parallel",),   # rows independent: shard across cores
            vmem_limit_bytes=vmem_limit,
        ),
        cost_estimate=cost,
    )(x2, w2)

    return out.reshape(orig_shape)


def rmsnorm_reference(x, weight, eps=1e-6):
    """Pure-JAX reference mirroring the PyTorch forward (f32 compute, cast back)."""
    xf = x.astype(jnp.float32)
    inv = jax.lax.rsqrt(jnp.mean(xf * xf, axis=-1, keepdims=True) + eps)
    return (xf * inv * weight.astype(jnp.float32)).astype(x.dtype)


if __name__ == "__main__":
    B, S, D = 2, 8, 256

    key = jax.random.PRNGKey(0)
    k_x, k_w = jax.random.split(key, 2)

    weight = 1.0 + 0.1 * jax.random.normal(k_w, (D,), dtype=jnp.float32)

    # float32 path
    x_f32 = jax.random.normal(k_x, (B, S, D), dtype=jnp.float32)
    out_f32 = rmsnorm_forward(x_f32, weight)
    jax.block_until_ready(out_f32)
    ref_f32 = rmsnorm_reference(x_f32, weight)
    assert out_f32.dtype == x_f32.dtype
    assert jnp.allclose(out_f32, ref_f32, atol=1e-5, rtol=1e-5), "f32 mismatch"

    # bf16 path (typical transformer activations; compute still f32 internally)
    x_bf16 = x_f32.astype(jnp.bfloat16)
    out_bf16 = rmsnorm_forward(x_bf16, weight)
    jax.block_until_ready(out_bf16)
    ref_bf16 = rmsnorm_reference(x_bf16, weight)
    assert out_bf16.dtype == jnp.bfloat16
    assert jnp.allclose(out_bf16.astype(jnp.float32), ref_bf16.astype(jnp.float32),
                        atol=2e-2, rtol=2e-2), "bf16 mismatch"

    # Ragged-N path (N not a multiple of the row tile; no pad/slice round-trip)
    x_rag = jax.random.normal(k_x, (3, 7, D), dtype=jnp.float32)
    out_rag = rmsnorm_forward(x_rag, weight)
    jax.block_until_ready(out_rag)
    assert jnp.allclose(out_rag, rmsnorm_reference(x_rag, weight),
                        atol=1e-5, rtol=1e-5), "ragged mismatch"

    print("KERNEL_OK")
</pallas_src>

<mosaic_0001>
module attributes {stable_mosaic.version = 11 : i64} {
  func.func @rmsnorm_kernel(%arg0: i32, %arg1: memref<8x256xf32, #tpu.memory_space<vmem>>, %arg2: memref<1x256xf32, #tpu.memory_space<vmem>>, %arg3: memref<8x256xf32, #tpu.memory_space<vmem>>) attributes {dimension_semantics = [#tpu.dimension_semantics<parallel>], iteration_bounds = array<i64: 2>, scalar_prefetch = 0 : i64, scratch_operands = 0 : i64, tpu.core_type = #tpu.core_type<tc>, window_params = [{transform_indices = @transform_0, window_bounds = array<i64: 8, 256>}, {pipeline_mode = #tpu.pipeline_mode<synchronous>, transform_indices = @transform_1, window_bounds = array<i64: 1, 256>}, {transform_indices = @transform_2, window_bounds = array<i64: 8, 256>}]} {
    %c0 = arith.constant 0 : index
    %c0_0 = arith.constant 0 : index
    %0 = vector.load %arg1[%c0, %c0_0] : memref<8x256xf32, #tpu.memory_space<vmem>>, vector<8x256xf32>
    %1 = arith.mulf %0, %0 : vector<8x256xf32>
    %cst = arith.constant dense<0.000000e+00> : vector<8xf32>
    %2 = vector.multi_reduction <add>, %1, %cst [1] : vector<8x256xf32> to vector<8xf32>
    %3 = vector.shape_cast %2 : vector<8xf32> to vector<8x1xf32>
    %cst_1 = arith.constant 2.560000e+02 : f32
    %4 = vector.broadcast %cst_1 : f32 to vector<8x1xf32>
    %5 = arith.divf %3, %4 : vector<8x1xf32>
    %cst_2 = arith.constant 9.99999997E-7 : f32
    %6 = vector.broadcast %cst_2 : f32 to vector<8x1xf32>
    %7 = arith.addf %5, %6 : vector<8x1xf32>
    %8 = math.rsqrt %7 : vector<8x1xf32>
    %9 = vector.broadcast %8 : vector<8x1xf32> to vector<8x256xf32>
    %10 = arith.mulf %0, %9 : vector<8x256xf32>
    %c0_3 = arith.constant 0 : index
    %c0_4 = arith.constant 0 : index
    %11 = vector.load %arg2[%c0_3, %c0_4] : memref<1x256xf32, #tpu.memory_space<vmem>>, vector<1x256xf32>
    %12 = vector.broadcast %11 : vector<1x256xf32> to vector<8x256xf32>
    %13 = arith.mulf %10, %12 : vector<8x256xf32>
    %c0_5 = arith.constant 0 : index
    %c0_6 = arith.constant 0 : index
    %14 = vector.load %arg3[%c0_5, %c0_6] : memref<8x256xf32, #tpu.memory_space<vmem>>, vector<8x256xf32>
    tpu.vector_store %arg3[%c0_5, %c0_6], %13 {strides = array<i32>} : memref<8x256xf32, #tpu.memory_space<vmem>>, vector<8x256xf32>,
    return
  }
  func.func @transform_0(%arg0: i32) -> (i32, i32) {
    %c0_i32 = arith.constant 0 : i32
    %c0_i32_0 = arith.constant 0 : i32
    return %arg0, %c0_i32 : i32, i32
  }
  func.func @transform_1(%arg0: i32) -> (i32, i32) {
    %c0_i32 = arith.constant 0 : i32
    %c0_i32_0 = arith.constant 0 : i32
    %c0_i32_1 = arith.constant 0 : i32
    return %c0_i32, %c0_i32_0 : i32, i32
  }
  func.func @transform_2(%arg0: i32) -> (i32, i32) {
    %c0_i32 = arith.constant 0 : i32
    %c0_i32_0 = arith.constant 0 : i32
    return %arg0, %c0_i32 : i32, i32
  }
}

</mosaic_0001>

<bundles_post_ra>
// kernel: tpu_custom_call.1
= control target key start
LH: loop header
LB: loop body
LE: loop exit
PB: predicated region body
PF: predicated region fallthrough
CT: control target
= control target key end

     0   :  { %7 = vsyncpa [#allocation3], 0  ;;  %s723_s0 = inlined_call_operand.hbm [shape: f32[16,256], index: 0, kind: input, shape index: {}]   ;;  %s724_s1 = inlined_call_operand.hbm [shape: f32[1,256], index: 1, kind: input, shape index: {}]   ;;  %s725_s2 = inlined_call_operand.hbm [shape: f32[16,256], index: 2, kind: output, shape index: {}]  }
   0x1   :  { %9 = vsyncpa [#allocation3 + $0x1], 0 }
   0x2   :  { %10 = vsyncpa [#allocation6], 0 }
   0x3   :  { %11 = vsyncpa [#allocation4], 0 }
   0x4   :  { %13 = vsyncpa [#allocation4 + $0x1], 0  ;;  %s522_s9 = smov 0   ;;  %s524_s10 = smov 0  }
   0x5   :  { %s526_s11 = smov 0   ;;  %s528_s12 = smov 0  }
   0x6 LB: > { %s543_s13 = sadd.s32 4294967295, %s502_s12   ;;  %s297_s14 = sadd.s32 4294967294, %s502_s12   ;;  %s502_s12 = sphi %s528_s12, %s749_s12   ;;  %s498_s11 = sphi %s526_s11, %s748_s11   ;;  %s494_s10 = sphi %s524_s10, %s747_s10   ;;  %s490_s9 = sphi %s522_s9, %s746_s9  }
   0x7   : > { %p39_p0 = scmp.ne.s32.totalorder %s494_s10, %s490_s9  ;;  %p726_p1 = scmp.eq.s32.totalorder %s543_s13, 0 }
   0x8   : > { %p90_p3 = scmp.eq.s32.totalorder %s297_s14, 1  ;;  %p298_p5 = scmp.ge.s32.totalorder %s502_s12, 1 }
   0x9   : > { %p552_p4 = por %p726_p1, %p39_p0  ;;  %p97_p7 = scmp.lt.s32.totalorder %s502_s12, 3 }
   0xa   : > { %p557_p6 = por %p90_p3, %p39_p0  ;;  %s504_s18 = smov [#allocation5]  }
   0xb   : > { %s729_s15 = scalar_select %p552_p4, 1, 0 }
   0xc   : > { %s730_s16 = scalar_select %p557_p6, 1, 0 }
   0xd   : > { %p562_p8 = pnand %p298_p5, %p97_p7  ;;  %s110_s19 = sshll.u32 %s504_s18, 4  ;;  %s111_s19 = int_to_ptr.vmem [resolvable:$true] %s110_s19 }
   0xe   : > { %s570_s20 = sadd.s32 1, %s502_s12   ;;  %s26_s24 = sadd.s32 1, %s498_s11 }
   0xf   : > { %s731_s17 = scalar_select %p562_p8, 1, 0 }
  0x10   : > { %p323_p10 = pneg %p562_p8  ;;  %s23_s22 = ssub.s32 %s502_s12, %s570_s20 }
  0x11   : > { %p580_p12 = scmp.eq.s32.totalorder %s23_s22, 0  ;;  %s374_s27 = scalar_lea.hbm %s724_s1, 32 }
  0x12   : > { %p574_p11 = pnand %p323_p10, %p726_p1  ;;  %p375_p0 = scmp.ne.s32.totalorder %s724_s1, %s374_s27 }
  0x13   : > { %s733_s23 = scalar_select %p580_p12, 1, 0 }
  0x14   : > { %p376_p3 = pneg %p574_p11  ;;  %p381_p10 = scmp.lt.u32.totalorder %s374_s27, %s724_s1 }
  0x16   : > { %p377_p5 = pnand %p376_p3, %p375_p0 }
  0x18   : > { %p378_p7 = pneg %p377_p5 }
  0x1a   : > { %p383_p9 = pnand %p381_p10, %p378_p7 }
  0x1c   : > { %386 = shalt.err (!%p383_p9)
}
  0x1d   : > { %s387_s4 = scalar_lea.vmem %s111_s19, 32  ;;  %p395_p6 = scmp.lt.s32.totalorder %s111_s19, %s111_s19 }
  0x1e   : > { %p388_p1 = scmp.ne.s32.totalorder %s111_s19, %s387_s4  ;;  %p396_p4 = scmp.lt.s32.totalorder %s387_s4, %s387_s4 }
  0x20   : > { %p390_p2 = pnand %p388_p1, %p376_p3  ;;  %p397_p8 = por %p396_p4, %p395_p6 }
  0x22   : > { %p391_p13 = pneg %p390_p2 }
  0x24   : > { %p398_p12 = pnand %p397_p8, %p391_p13 }
  0x26   : > { %401 = shalt.err (!%p398_p12)
}
  0x27   : > { %326 = dma.hbm_to_vmem [thread:$0]  (!%p574_p11), %s724_s1, 32, %s111_s19, [#allocation6]  }
  0x28   : > { %p734_p1 = scmp.ne.s32.totalorder %s733_s23, 0  ;;  %p34_p2 = scmp.eq.s32.totalorder %s502_s12, 0 }
  0x29   : > { %p735_p4 = scmp.ne.s32.totalorder %s498_s11, %s494_s10  ;;  %p736_p6 = scmp.eq.s32.totalorder %s543_s13, 1 }
  0x2a   : > { %s606_s7 = scalar_select %p734_p1, %s498_s11, %s26_s24  }
  0x2b   : > { %p614_p8 = por %p736_p6, %p735_p4  ;;  %p336_p9 = scmp.lt.s32.totalorder %s502_s12, 2 }
  0x2c   : > { %s121_s14 = sand.u32 1, %s498_s11   ;;  %p738_p12 = pmov %p735_p4 }
  0x2d   : > { %s301_s18 = sshll.u32 %s121_s14, 4  ;;  %s313_s21 = sshll.u32 %s502_s12, 8 }
  0x2e   : > { %p35_p13 = por %p34_p2, %p738_p12  ;;  %s627_s19 = scalar_lea.hbm %s723_s0, %s313_s21 }
  0x2f   : > { %s125_s23 = scalar_lea.vmem [#allocation2], %s301_s18  ;;  %s122_s27 = scalar_lea.sflag [#allocation3], %s121_s14 }
  0x30   : > { %s133_s24 = sshll.u32 %s125_s23, 4  ;;  %p629_p11 = pnand %p336_p9, %p35_p13  ;;  %s633_s24 = int_to_ptr.vmem [resolvable:$true] %s133_s24 }
  0x31   : > { %s402_s28 = scalar_lea.hbm %s627_s19, 256  ;;  %s407_s3 = scalar_lea.hbm %s723_s0, 512 }
  0x32   : > { %p403_p0 = scmp.ne.s32.totalorder %s627_s19, %s402_s28  ;;  %p404_p3 = pneg %p629_p11 }
  0x33   : > { %p408_p10 = scmp.lt.u32.totalorder %s627_s19, %s723_s0  ;;  %p409_p1 = scmp.lt.u32.totalorder %s407_s3, %s402_s28 }
  0x34   : > { %p405_p5 = pnand %p404_p3, %p403_p0  ;;  %p411_p4 = scmp.lt.u32.totalorder %s402_s28, %s627_s19 }
  0x35   : > { %p410_p2 = por %p409_p1, %p408_p10 }
  0x36   : > { %p406_p7 = pneg %p405_p5 }
  0x37   : > { %p412_p6 = por %p411_p4, %p410_p2 }
  0x39   : > { %p413_p9 = pnand %p412_p6, %p406_p7 }
  0x3b   : > { %416 = shalt.err (!%p413_p9)
}
  0x3c   : > { %s417_s6 = scalar_lea.vmem %s633_s24, 256  ;;  %s505_s14 = smov [#allocation2]  }
  0x3d   : > { %p418_p12 = scmp.ne.s32.totalorder %s633_s24, %s417_s6  ;;  %s422_s18 = sshll.u32 %s505_s14, 4  ;;  %s423_s18 = int_to_ptr.vmem [resolvable:$false] %s422_s18 }
  0x3e   : > { %s424_s21 = scalar_lea.vmem %s423_s18, 512  ;;  %p425_p5 = scmp.lt.s32.totalorder %s633_s24, %s423_s18 }
  0x3f   : > { %p420_p13 = pnand %p418_p12, %p404_p3  ;;  %p426_p10 = scmp.lt.s32.totalorder %s424_s21, %s417_s6 }
  0x41   : > { %p421_p0 = pneg %p420_p13  ;;  %p427_p1 = por %p426_p10, %p425_p5 }
  0x43   : > { %p428_p2 = pnand %p427_p1, %p421_p0 }
  0x45   : > { %431 = shalt.err (!%p428_p2)
}
  0x46   : > { %330 = dma.hbm_to_vmem [thread:$0]  (!%p629_p11), %s627_s19, 256, %s633_s24, %s122_s27  }
  0x47   : > { %p740_p7 = scmp.ne.s32.totalorder %s731_s17, 0 }
  0x48   : > { %s663_s22 = sand.u32 (!%p740_p7), 1, %s494_s10   ;;  %p741_p3 = scmp.ne.s32.totalorder (!%p740_p7), %s729_s15, 0 }
  0x49   : > { %142 = sbr.rel (%p740_p7) target bundleno = 264 (0x108), region = 28  ;;  %s305_s25 = sshll.u32 (!%p740_p7), %s663_s22, 4 }
  0x4a   : > { %s145_s23 = scalar_lea.sflag (!%p740_p7), [#allocation3], %s663_s22  ;;  %s148_s28 = scalar_lea.vmem (!%p740_p7), [#allocation2], %s305_s25 }
  0x50   : > { %477 = dma.done.wait (%p741_p3), %s145_s23, 256  }
  0x51   : > { %479 = vsyncadd (%p741_p3), %s145_s23, 4294967040  ;;  %p742_p4 = scmp.eq.s32.totalorder %s543_s13, 0 }
  0x53   : > { %481 = dma.done.wait (%p742_p4), [#allocation6], 32   ;;  %p743_p11 = pmov %p742_p4 }
  0x54   : > { %v173_v0 = vld [vmem:[%s148_s28] sm:$0xff]  ;;  %v174_v1 = vld [vmem:[%s148_s28 + $0x8] sm:$0xff]  ;;  %v188_v7 = vlaneseq  ;;  %s314_s15 = sshll.u32 %s543_s13, 8  ;;  %s172_s17 = scalar_lea.vmem [#allocation7], %s305_s25 }
  0x55   : > { %483 = vsyncadd (%p743_p11), [#allocation6], 4294967264  ;;  %v175_v2 = vmul.f32 %v173_v0, %v173_v0  ;;  %v176_v3 = vmul.f32 %v174_v1, %v174_v1  ;;  %v186_v12 = vld [vmem:[#allocation5] sm:$0x3]  ;;  %s217_s19 = sshll.u32 %s172_s17, 4  ;;  %s679_s27 = scalar_lea.hbm %s725_s2, %s314_s15  ;;  %s681_s19 = int_to_ptr.vmem [resolvable:$true] %s217_s19 }
  0x56   : > { %v189_v9 = vshrl.u32 %v188_v7, 7  ;;  %s203_s29 = scalar_lea.sflag [#allocation4], %s663_s22  ;;  %s432_s13 = scalar_lea.vmem %s681_s19, 256 }
  0x57   : > { %v177_v4 = vadd.f32 %v176_v3, %v175_v2  ;;  %p433_p6 = scmp.ne.s32.totalorder %s681_s19, %s432_s13  ;;  %s506_s30 = smov [#allocation7]  }
  0x58   : > { %v190_v10 = vsub.s32 0, %v189_v9  ;;  %v194_v11 = vsub.s32 1, %v189_v9  ;;  %s436_s3 = sshll.u32 %s506_s30, 4  ;;  %s437_s3 = int_to_ptr.vmem [resolvable:$false] %s436_s3 }
  0x59   : > { %178 = vadd.xlane.f32.xlu0 %v177_v4  ;;  %p434_p9 = pnand %p433_p6, %p614_p8  ;;  %s438_s4 = scalar_lea.vmem %s437_s3, 512 }
  0x5a   : > { %v191_v13 = vrot.slane %v186_v12, %v190_v10  ;;  %v195_v14 = vrot.slane %v186_v12, %v194_v11  ;;  %p439_p13 = scmp.lt.s32.totalorder %s681_s19, %s437_s3  ;;  %p440_p0 = scmp.lt.s32.totalorder %s438_s4, %s432_s13 }
  0x5b   : > { %p435_p12 = pneg %p434_p9 }
  0x5c   : > { %p441_p5 = por %p440_p0, %p439_p13 }
  0x5e   : > { %p442_p10 = pnand %p441_p5, %p435_p12 }
  0xe6   : > { %v179_v5 = vpop.xlane.xlu0 %178 }
  0xe7   : > { %v181_v6 = vmul.f32 0.00390625, %v179_v5 }
  0xe9   : > { %v182_v8 = vadd.f32 1e-06, %v181_v6 }
  0xeb   : > { %372 = vrsqrt.f32 %v182_v8 }
  0xf5   : > { %v373_v15 = vpop.eup %372 }
  0xf6   : > { %v184_v16 = vmul.f32 %v373_v15, %v173_v0  ;;  %v185_v17 = vmul.f32 %v373_v15, %v174_v1 }
  0xf8   : > { %v198_v18 = vmul.f32 %v191_v13, %v184_v16  ;;  %v199_v19 = vmul.f32 %v195_v14, %v185_v17 }
  0xfa   : > { %200 = vst [vmem:[%s172_s17] sm:$0xff] %v198_v18  ;;  %201 = vst [vmem:[%s172_s17 + $0x8] sm:$0xff] %v199_v19 }
  0xfb   : > { %445 = shalt.err (!%p442_p10)
}
  0xfc   : > { %s446_s5 = scalar_lea.hbm %s679_s27, 256  ;;  %s450_s18 = scalar_lea.hbm %s725_s2, 512 }
  0xfd   : > { %p447_p1 = scmp.ne.s32.totalorder %s679_s27, %s446_s5  ;;  %p451_p3 = scmp.lt.u32.totalorder %s679_s27, %s725_s2 }
  0xfe   : > { %p452_p4 = scmp.lt.u32.totalorder %s450_s18, %s446_s5  ;;  %p454_p6 = scmp.lt.u32.totalorder %s446_s5, %s679_s27 }
  0xff   : > { %p448_p2 = pnand %p447_p1, %p614_p8 }
 0x100   : > { %p453_p11 = por %p452_p4, %p451_p3 }
 0x101   : > { %p449_p7 = pneg %p448_p2 }
 0x102   : > { %p455_p9 = por %p454_p6, %p453_p11 }
 0x104   : > { %p456_p12 = pnand %p455_p9, %p449_p7 }
 0x106   : > { %459 = shalt.err (!%p456_p12)
}
 0x107   : > { %321 = dma.vmem_to_hbm [thread:$0]  (%p614_p8), %s681_s19, 256, %s679_s27, %s203_s29  }
 0x108 PF: > { %s229_s25 = sand.u32 1, %s490_s9   ;;  %p744_p13 = scmp.ne.s32.totalorder %s730_s16, 0 }
 0x109   : > { %p745_p0 = scmp.ge.s32.totalorder %s502_s12, 2  ;;  %s230_s23 = scalar_lea.sflag [#allocation4], %s229_s25 }
 0x10b   : > { %p332_p5 = pnand %p745_p0, %p744_p13 }
 0x10d   : > { %485 = dma.done.wait (!%p332_p5), %s230_s23, 256  }
 0x10e   : > { %487 = vsyncadd (!%p332_p5), %s230_s23, 4294967040  ;;  %p16_p10 = scmp.ge.s32.totalorder %s570_s20, 4   ;;  %s746_s9 = smov %s494_s10 }
 0x10f   : > { %s747_s10 = smov %s498_s11  ;;  %s748_s11 = smov %s606_s7 }
 0x110   : > { %s749_s12 = smov %s570_s20  ;;  %18 = sbr.rel (!%p16_p10) target bundleno = 6 (0x6), region = 77 }
 0x117   :  { %235 = vsyncpa [#allocation3], 1 }
 0x118   :  { %237 = vsyncpa [#allocation3 + $0x1], 1 }
 0x119   :  { %238 = vsyncpa [#allocation6], 1 }
 0x11a   :  { %239 = vsyncpa [#allocation4], 1 }
 0x11b   :  { %241 = vsyncpa [#allocation4 + $0x1], 1 }

</bundles_post_ra>
